<compile_context>
chip_gen: v5e
topology: v5e:2x2
jax: 0.10.0
libtpu: 0.0.40
codegen_flags: <defaults>
</compile_context>

<pallas_src>
import functools

import jax
import jax.numpy as jnp
from jax.experimental import pallas as pl
from jax.experimental.pallas import tpu as pltpu


def _round_up(x, m):
    return ((x + m - 1) // m) * m


# --------------------------------------------------------------------------
# Pre-pass: row-wise L2 normalization (F.normalize equivalent).
# --------------------------------------------------------------------------
def _normalize_kernel(x_ref, o_ref):
    x = x_ref[...].astype(jnp.float32)                       # (TM, D)
    ssq = jnp.sum(x * x, axis=-1, keepdims=True)             # (TM, 1)
    # x * rsqrt(max(||x||^2, eps^2)) ~= x / max(||x||, eps)  (eps = 1e-12)
    o_ref[...] = x * jax.lax.rsqrt(jnp.maximum(ssq, 1e-24))


def _normalize_rows(x, tm):
    n_pad, d = x.shape
    nb = n_pad // tm
    return pl.pallas_call(
        _normalize_kernel,
        out_shape=jax.ShapeDtypeStruct((n_pad, d), jnp.float32),
        grid_spec=pltpu.PrefetchScalarGridSpec(
            num_scalar_prefetch=0,
            grid=(nb,),
            in_specs=[pl.BlockSpec((tm, d), lambda i: (i, 0))],
            out_specs=pl.BlockSpec((tm, d), lambda i: (i, 0)),
        ),
        compiler_params=pltpu.CompilerParams(
            dimension_semantics=("parallel",)),
    )(x)


# --------------------------------------------------------------------------
# Main tiled circle-loss kernel: one (TM, TN) similarity tile per grid step.
# --------------------------------------------------------------------------
def _circle_tile_kernel(xi_ref, xj_ref, li_ref, lj_ref, out_p_ref, out_n_ref,
                        *, scale, margin, n_valid, tm, tn):
    i = pl.program_id(0)
    j = pl.program_id(1)

    # Init the per-row-block partial accumulators at the first j step.
    @pl.when(j == 0)
    def _():
        out_p_ref[...] = jnp.zeros_like(out_p_ref)
        out_n_ref[...] = jnp.zeros_like(out_n_ref)

    # Only upper-triangular block pairs contribute (strict-upper element mask).
    @pl.when(j >= i)
    def _():
        xi = xi_ref[...]                                     # (TM, D) f32, normalized
        xj = xj_ref[...]                                     # (TN, D) f32, normalized

        # sim tile: contract last dims of both operands (no transpose relayout).
        sim = jax.lax.dot_general(
            xi, xj, (((1,), (1,)), ((), ())),
            preferred_element_type=jnp.float32)              # (TM, TN)

        li = li_ref[...]                                     # (TM, 1) int32
        lj = lj_ref[...]                                     # (1, TN) int32
        same = li == lj                                      # (TM, TN) bool

        # Global strict-upper-triangle + valid-column mask (folds padding).
        gr = jax.lax.broadcasted_iota(jnp.int32, (tm, tn), 0) + i * tm
        gc = jax.lax.broadcasted_iota(jnp.int32, (tm, tn), 1) + j * tn
        triu_valid = jnp.logical_and(gr < gc, gc < n_valid)

        pos_mask = jnp.logical_and(same, triu_valid)
        neg_mask = jnp.logical_and(jnp.logical_not(same), triu_valid)

        margin_p = 1.0 - margin
        margin_n = margin
        alpha_p = jnp.maximum(1.0 + margin - sim, 0.0)       # relu
        alpha_n = jnp.maximum(sim + margin, 0.0)

        # Fused exponential: each strict-upper element is exactly one of
        # pos/neg, so select the exponent first and take a single exp.
        arg = jnp.where(pos_mask,
                        -scale * alpha_p * (sim - margin_p),
                        scale * alpha_n * (sim - margin_n))
        e = jnp.exp(arg)

        p_part = jnp.sum(jnp.where(pos_mask, e, 0.0), keepdims=True)  # (1, 1)
        n_part = jnp.sum(jnp.where(neg_mask, e, 0.0), keepdims=True)  # (1, 1)

        out_p_ref[...] += p_part.reshape(1, 1, 1)
        out_n_ref[...] += n_part.reshape(1, 1, 1)


# --------------------------------------------------------------------------
# Wrapper: shape handling, padding, tiling, final log(1 + loss_p * loss_n).
# --------------------------------------------------------------------------
def circle_loss_v2(feats, labels, scale=32, margin=0.25, similarity="cos"):
    """JAX/Pallas equivalent of CircleLossV2.forward."""
    if feats.ndim == 3:
        b, s, d = feats.shape
        labels = jnp.repeat(labels, s)            # labels.repeat_interleave(S)
        feats = feats.reshape(-1, d)
    elif feats.ndim == 2:
        pass
    else:
        raise ValueError("Invalid shape of input")

    n, d = feats.shape
    assert labels.shape[0] == n

    feats = feats.astype(jnp.float32)
    labels = labels.astype(jnp.int32)

    # Tile sizes: one tile for small N, 256x256 sim tiles otherwise.
    if n <= 256:
        tm = tn = _round_up(n, 8)
    else:
        tm = tn = 256
    n_pad = _round_up(n, tm)
    nb = n_pad // tm

    if n_pad != n:
        feats = jnp.pad(feats, ((0, n_pad - n), (0, 0)))
        labels = jnp.pad(labels, (0, n_pad - n))

    lab_col = labels.reshape(n_pad, 1)            # row-tile labels (column vec)
    lab_row = labels.reshape(1, n_pad)            # col-tile labels (row vec)

    if similarity == "cos":
        xn = _normalize_rows(feats, tm)
    elif similarity == "dot":
        xn = feats
    else:
        raise ValueError("This similarity is not implemented.")

    kernel = functools.partial(
        _circle_tile_kernel, scale=float(scale), margin=float(margin),
        n_valid=n, tm=tm, tn=tn)

    cost = pl.CostEstimate(
        flops=2 * n * n * d,
        transcendentals=(n * n) // 2,
        bytes_accessed=(nb + 1) * n_pad * d * 4 + 2 * n_pad * 4)

    # Double-buffered feats tiles + in-flight tile temporaries, with headroom
    # (capped below v7x's 64 MiB physical VMEM).
    vmem_est = 4 * (tm * d + tn * d) * 4 + 16 * tm * tn * 4 + (2 << 20)
    vmem_limit = int(min(56 << 20, max(16 << 20, vmem_est)))

    out_p, out_n = pl.pallas_call(
        kernel,
        out_shape=(jax.ShapeDtypeStruct((nb, 8, 128), jnp.float32),
                   jax.ShapeDtypeStruct((nb, 8, 128), jnp.float32)),
        grid_spec=pltpu.PrefetchScalarGridSpec(
            num_scalar_prefetch=0,
            grid=(nb, nb),
            in_specs=[
                pl.BlockSpec((tm, d), lambda i, j: (i, 0)),   # row feats tile
                pl.BlockSpec((tn, d), lambda i, j: (j, 0)),   # col feats tile
                pl.BlockSpec((tm, 1), lambda i, j: (i, 0)),   # row labels
                pl.BlockSpec((1, tn), lambda i, j: (0, j)),   # col labels
            ],
            out_specs=(
                pl.BlockSpec((1, 8, 128), lambda i, j: (i, 0, 0)),
                pl.BlockSpec((1, 8, 128), lambda i, j: (i, 0, 0)),
            ),
        ),
        compiler_params=pltpu.CompilerParams(
            dimension_semantics=("parallel", "arbitrary"),
            vmem_limit_bytes=vmem_limit,
        ),
        cost_estimate=cost,
    )(xn, xn, lab_col, lab_row)

    loss_p = jnp.sum(out_p[:, 0, 0])
    loss_n = jnp.sum(out_n[:, 0, 0])
    return jnp.log(1.0 + loss_p * loss_n)


# --------------------------------------------------------------------------
# Pure-JAX reference mirroring the PyTorch module, for verification.
# --------------------------------------------------------------------------
def _reference(feats, labels, scale=32, margin=0.25, similarity="cos"):
    if feats.ndim == 3:
        labels = jnp.repeat(labels, feats.shape[1])
        feats = feats.reshape(-1, feats.shape[-1])
    n = feats.shape[0]
    if similarity == "cos":
        x = feats / jnp.maximum(
            jnp.linalg.norm(feats, axis=-1, keepdims=True), 1e-12)
    else:
        x = feats
    sim = jnp.dot(x, x.T, precision=jax.lax.Precision.HIGHEST)
    same = labels[:, None] == labels[None, :]
    triu = jnp.triu(jnp.ones((n, n), bool), k=1)
    pos_mask = same & triu
    neg_mask = (~same) & triu
    alpha_p = jax.nn.relu(-sim + 1 + margin)
    alpha_n = jax.nn.relu(sim + margin)
    loss_p = jnp.sum(
        jnp.where(pos_mask, jnp.exp(-scale * alpha_p * (sim - (1 - margin))), 0.0))
    loss_n = jnp.sum(
        jnp.where(neg_mask, jnp.exp(scale * alpha_n * (sim - margin)), 0.0))
    return jnp.log(1 + loss_p * loss_n)


if __name__ == "__main__":
    key = jax.random.PRNGKey(0)
    k1, k2, k3, k4 = jax.random.split(key, 4)

    # 1) 3-D input path: (batch=2, seq=8, hidden=32) -> flattened to (16, 32).
    feats3 = jax.random.normal(k1, (2, 8, 32), dtype=jnp.float32)
    labels3 = jax.random.randint(k2, (2,), 0, 4, dtype=jnp.int32)
    out1 = jax.block_until_ready(circle_loss_v2(feats3, labels3, 32, 0.25))
    ref1 = jax.block_until_ready(_reference(feats3, labels3, 32, 0.25))
    assert jnp.allclose(out1, ref1, rtol=1e-3, atol=1e-3), (out1, ref1)

    # 2) 2-D input with N not a multiple of 8 (exercises padding/valid mask).
    feats2 = jax.random.normal(k3, (37, 32), dtype=jnp.float32)
    labels2 = jax.random.randint(k4, (37,), 0, 5, dtype=jnp.int32)
    out2 = jax.block_until_ready(circle_loss_v2(feats2, labels2, 32, 0.25))
    ref2 = jax.block_until_ready(_reference(feats2, labels2, 32, 0.25))
    assert jnp.allclose(out2, ref2, rtol=1e-3, atol=1e-3), (out2, ref2)

    # 3) 'dot' similarity path (feats scaled down to keep the exps finite).
    featsd = feats2 * 0.1
    out3 = jax.block_until_ready(
        circle_loss_v2(featsd, labels2, 32, 0.25, similarity="dot"))
    ref3 = jax.block_until_ready(
        _reference(featsd, labels2, 32, 0.25, similarity="dot"))
    assert jnp.allclose(out3, ref3, rtol=1e-3, atol=1e-3), (out3, ref3)

    print("KERNEL_OK")
</pallas_src>

<mosaic_0001>
module attributes {stable_mosaic.version = 11 : i64} {
  func.func @_normalize_kernel(%arg0: i32, %arg1: memref<16x32xf32, #tpu.memory_space<vmem>>, %arg2: memref<16x32xf32, #tpu.memory_space<vmem>>) attributes {dimension_semantics = [#tpu.dimension_semantics<parallel>], iteration_bounds = array<i64: 1>, scalar_prefetch = 0 : i64, scratch_operands = 0 : i64, tpu.core_type = #tpu.core_type<tc>, window_params = [{transform_indices = @transform_0, window_bounds = array<i64: 16, 32>}, {transform_indices = @transform_1, window_bounds = array<i64: 16, 32>}]} {
    %c0 = arith.constant 0 : index
    %c0_0 = arith.constant 0 : index
    %0 = vector.load %arg1[%c0, %c0_0] : memref<16x32xf32, #tpu.memory_space<vmem>>, vector<16x32xf32>
    %1 = arith.mulf %0, %0 : vector<16x32xf32>
    %cst = arith.constant dense<0.000000e+00> : vector<16xf32>
    %2 = vector.multi_reduction <add>, %1, %cst [1] : vector<16x32xf32> to vector<16xf32>
    %3 = vector.shape_cast %2 : vector<16xf32> to vector<16x1xf32>
    %cst_1 = arith.constant 1.000000e-24 : f32
    %4 = vector.broadcast %cst_1 : f32 to vector<16x1xf32>
    %5 = arith.maximumf %3, %4 : vector<16x1xf32>
    %6 = math.rsqrt %5 : vector<16x1xf32>
    %7 = vector.broadcast %6 : vector<16x1xf32> to vector<16x32xf32>
    %8 = arith.mulf %0, %7 : vector<16x32xf32>
    %c0_2 = arith.constant 0 : index
    %c0_3 = arith.constant 0 : index
    %9 = vector.load %arg2[%c0_2, %c0_3] : memref<16x32xf32, #tpu.memory_space<vmem>>, vector<16x32xf32>
    tpu.vector_store %arg2[%c0_2, %c0_3], %8 {strides = array<i32>} : memref<16x32xf32, #tpu.memory_space<vmem>>, vector<16x32xf32>,
    return
  }
  func.func @transform_0(%arg0: i32) -> (i32, i32) {
    %c0_i32 = arith.constant 0 : i32
    %c0_i32_0 = arith.constant 0 : i32
    return %arg0, %c0_i32 : i32, i32
  }
  func.func @transform_1(%arg0: i32) -> (i32, i32) {
    %c0_i32 = arith.constant 0 : i32
    %c0_i32_0 = arith.constant 0 : i32
    return %arg0, %c0_i32 : i32, i32
  }
}

</mosaic_0001>

<bundles_post_ra>
// kernel: tpu_custom_call.1
= control target key start
LH: loop header
LB: loop body
LE: loop exit
PB: predicated region body
PF: predicated region fallthrough
CT: control target
= control target key end

     0   :  { %6 = vsyncpa [#allocation3], 0  ;;  %s171_s0 = inlined_call_operand.hbm [shape: f32[16,32], index: 0, kind: input, shape index: {}]   ;;  %s172_s1 = inlined_call_operand.hbm [shape: f32[16,32], index: 1, kind: output, shape index: {}]  }
   0x1   :  { %7 = vsyncpa [#allocation4], 0  ;;  %s12_s8 = sshll.u32 %s171_s0, 4  ;;  %s141_s9 = smov [#allocation2]   ;;  %s13_s8 = int_to_ptr.hbm [resolvable:$true] %s12_s8 }
   0x2   :  { %s14_s10 = sshll.u32 %s141_s9, 4  ;;  %s142_s11 = smov 128   ;;  %s15_s10 = int_to_ptr.vmem [resolvable:$true] %s14_s10 }
   0x3   :  { %s143_s12 = smov 8  }
   0x4   :  { %20 = dma.hbm_to_vmem [thread:$0]  %s13_s8, 256, %s15_s10, [#allocation3], %s142_s11, %s142_s11, %s143_s12  }
   0x5   :  { %137 = dma.done.wait [#allocation3], 256  }
   0x6   :  { %138 = vsyncadd [#allocation3], 4294967040  ;;  %v25_v0 = vld [vmem:[#allocation2] sm:$0xff]  ;;  %vm29_vm0 = vcmask 261120   ;;  %v26_v2 = vld [vmem:[#allocation2 + $0x8] sm:$0xff]  ;;  %s144_s0 = smov [#allocation5]  }
   0x7   :  { %v27_v1 = vmul.f32 %v25_v0, %v25_v0  ;;  %v28_v4 = vmul.f32 %v26_v2, %v26_v2  ;;  %s66_s13 = sshll.u32 %s144_s0, 4  ;;  %s68_s16 = sshll.u32 %s172_s1, 4  ;;  %s67_s13 = int_to_ptr.vmem [resolvable:$true] %s66_s13  ;;  %s69_s16 = int_to_ptr.hbm [resolvable:$true] %s68_s16 }
   0x9   :  { %v30_v3 = vsel %vm29_vm0, %v27_v1, 0.0  ;;  %v33_v5 = vsel %vm29_vm0, %v28_v4, 0.0 }
   0xa   :  { %31 = vadd.xlane.f32.xlu0 %v30_v3 }
  0x12   :  { %34 = vadd.xlane.f32.xlu0 %v33_v5 }
  0x7d   :  { %v32_v6 = vpop.xlane.xlu0 %31 }
  0x7e   :  { %v36_v7 = vmax.f32 %v32_v6, 1e-24 }
  0x80   :  { %85 = vrsqrt.f32 %v36_v7  ;;  %vm44_vm2 = vweird.f32 %v36_v7 }
  0x85   :  { %v35_v8 = vpop.xlane.xlu0 %34 }
  0x86   :  { %v86_v9 = vpop.eup %85  ;;  %v37_v10 = vmax.f32 %v35_v8, 1e-24 }
  0x87   :  { %v39_v11 = vmul.f32 %v86_v9, %v36_v7  ;;  %vm45_vm1 = vweird.f32 %v86_v9 }
  0x88   :  { %87 = vrsqrt.f32 %v37_v10  ;;  %vm46_vm3 = vmor %vm44_vm2, %vm45_vm1  ;;  %vm54_vm5 = vweird.f32 %v37_v10 }
  0x89   :  { %v40_v12 = vmul.f32 %v86_v9, %v39_v11 }
  0x8b   :  { %v41_v13 = vmul.f32 0.5, %v40_v12 }
  0x8d   :  { %v42_v14 = vsub.f32 1.5, %v41_v13 }
  0x8e   :  { %v88_v15 = vpop.eup %87 }
  0x8f   :  { %v43_v16 = vmul.f32 %v86_v9, %v42_v14  ;;  %v49_v17 = vmul.f32 %v88_v15, %v37_v10  ;;  %vm55_vm4 = vweird.f32 %v88_v15 }
  0x90   :  { %vm56_vm6 = vmor %vm54_vm5, %vm55_vm4 }
  0x91   :  { %v47_v18 = vsel %vm46_vm3, %v86_v9, %v43_v16  ;;  %v50_v19 = vmul.f32 %v88_v15, %v49_v17 }
  0x92   :  { %v58_v20 = vmul.f32 %v47_v18, %v25_v0 }
  0x93   :  { %v51_v21 = vmul.f32 0.5, %v50_v19 }
  0x94   :  { %60 = vst.msk [vmem:[#allocation5] sm:$0xff] %vm29_vm0, %v58_v20 }
  0x95   :  { %v52_v22 = vsub.f32 1.5, %v51_v21 }
  0x97   :  { %v53_v23 = vmul.f32 %v88_v15, %v52_v22 }
  0x99   :  { %v57_v24 = vsel %vm56_vm6, %v88_v15, %v53_v23 }
  0x9a   :  { %v59_v25 = vmul.f32 %v57_v24, %v26_v2 }
  0x9c   :  { %61 = vst.msk [vmem:[#allocation5 + $0x8] sm:$0xff] %vm29_vm0, %v59_v25 }
  0x9d   :  { %74 = dma.vmem_to_hbm [thread:$0]  %s67_s13, 256, %s69_s16, [#allocation4], %s142_s11, %s142_s11, %s143_s12  }
  0x9e   :  { %139 = dma.done.wait [#allocation4], 256  }
  0x9f   :  { %140 = vsyncadd [#allocation4], 4294967040 }
  0xa0   :  { %79 = vsyncpa [#allocation3], 1 }
  0xa1   :  { %80 = vsyncpa [#allocation4], 1 }

</bundles_post_ra>
